<compile_context>
chip_gen: v7x
topology: tpu7x:2x2x1
jax: 0.10.0
libtpu: 0.0.40
codegen_flags: <defaults>
</compile_context>

<pallas_src>
import functools

import jax
import jax.numpy as jnp
from jax.experimental import pallas as pl
from jax.experimental.pallas import tpu as pltpu


def _tpu_generation():
    """Coarse TPU generation from the standard JAX device_kind string."""
    try:
        kind = jax.devices()[0].device_kind.lower()
    except Exception:  # pragma: no cover - defensive; assume conservative HW
        return "unknown"
    if "v5" in kind:
        return "v5"
    if "v6" in kind:
        return "v6"
    if "7" in kind:
        return "v7"
    return "unknown"


_GEN = _tpu_generation()

if _GEN in ("v5", "v6"):
    # 128 MiB physical VMEM, single TensorCore: go big, no min-step constraint.
    _TARGET_TILE_BYTES = 8 * 1024 * 1024
    _VMEM_LIMIT_BYTES = 96 * 1024 * 1024
    _MIN_GRID_STEPS = 1
else:
    # v7x (or unknown): 64 MiB physical VMEM, 2 TensorCores -> conservative
    # 4 MiB tiles, 48 MiB limit, and >= 4 grid steps so both cores stay fed.
    _TARGET_TILE_BYTES = 4 * 1024 * 1024
    _VMEM_LIMIT_BYTES = 48 * 1024 * 1024
    _MIN_GRID_STEPS = 4

# v5e has no bf16 VALU; v6e/v7x (and unknown/newer) do.
_BF16_VALU_OK = _GEN != "v5"


def _layer_norm_kernel(x_ref, a_ref, b_ref, o_ref, *, eps, d_hid, low_prec_tail):
    # x_ref: (tm, D) row tile; a_ref/b_ref: (1, D) resident params (pre-cast).
    x = x_ref[...].astype(jnp.float32)

    # Two-pass statistics over the true feature dim (more robust than
    # sum-of-squares, same cost: the mem-bound kernel hides the extra VALU op,
    # and (x - mu) is reused by the f32 output path).
    mu = jnp.sum(x, axis=-1, keepdims=True) * jnp.float32(1.0 / d_hid)
    diff = x - mu
    # torch.std is unbiased (ddof=1): var = sum((x - mu)^2) / (D - 1)
    var = jnp.sum(diff * diff, axis=-1, keepdims=True) * jnp.float32(1.0 / (d_hid - 1))
    sigma = jnp.sqrt(var)

    # Per-row reciprocal (EUP) instead of a full-tile divide; exact to keep
    # the tight tolerance vs. the reference.
    inv = pl.reciprocal(sigma + jnp.float32(eps), approx=False)

    if low_prec_tail:
        # bf16/fp16 elementwise tail (v6e/v7x only): statistics stay in f32,
        # but the output path runs in the input dtype — no full-tile f32
        # materialization on the store side, half the VALU pressure.
        xd = x_ref[...]
        dt = xd.dtype
        out = (xd - mu.astype(dt)) * inv.astype(dt)
        out = out * a_ref[...] + b_ref[...]
        o_ref[...] = out.astype(o_ref.dtype)
    else:
        out = diff * inv
        out = out * a_ref[...] + b_ref[...]
        o_ref[...] = out.astype(o_ref.dtype)


def _choose_row_tile(n, row_bytes, itemsize):
    """Row-tile size from the VMEM byte budget, sublane-aligned (no row cap)."""
    sub = 16 if itemsize == 2 else 8     # bf16/fp16 pack 16 rows per vreg
    if n <= sub:
        return n                          # full-array rows: always legal
    tm = max(sub, _TARGET_TILE_BYTES // max(row_bytes, 1))
    tm = max(sub, (tm // sub) * sub)
    if tm >= n:
        tm = n                            # whole array in one tile (full-dim block)
    # Keep enough grid steps for the single "parallel" axis to split across
    # v7x's two TensorCores (no-op on v5e/v6e where _MIN_GRID_STEPS == 1).
    while pl.cdiv(n, tm) < _MIN_GRID_STEPS and tm > sub:
        tm = max(sub, ((tm // 2) // sub) * sub)
    return tm


def layer_norm(z, a_2, b_2, eps=0.001):
    """z: (N, D) array. a_2, b_2: (D,) params. Matches the PyTorch forward."""
    n, d = z.shape
    if d == 1:
        # PyTorch: if z.size(1) == 1: return z
        return z
    assert d >= 2, "d_hid must be >= 2 for the unbiased-std (d-1) denominator"

    itemsize = jnp.dtype(z.dtype).itemsize
    low_prec_tail = (
        _BF16_VALU_OK
        and jnp.issubdtype(z.dtype, jnp.floating)
        and itemsize == 2
    )

    # Pre-cast the tiny params to the kernel's tail compute dtype so the body
    # does not re-run astype/broadcast every grid step; the constant index map
    # keeps the (1, D) block resident across the whole grid.
    param_dtype = z.dtype if low_prec_tail else jnp.float32
    a_in = a_2.astype(param_dtype).reshape(1, d)
    b_in = b_2.astype(param_dtype).reshape(1, d)

    tm = _choose_row_tile(n, d * itemsize, itemsize)
    grid = (pl.cdiv(n, tm),)

    kernel = functools.partial(
        _layer_norm_kernel, eps=eps, d_hid=d, low_prec_tail=low_prec_tail
    )

    return pl.pallas_call(
        kernel,
        out_shape=jax.ShapeDtypeStruct((n, d), z.dtype),
        grid_spec=pltpu.PrefetchScalarGridSpec(
            num_scalar_prefetch=0,
            grid=grid,
            in_specs=[
                pl.BlockSpec((tm, d), lambda i: (i, 0)),   # x row tile (full-D block)
                pl.BlockSpec((1, d), lambda i: (0, 0)),    # a_2 (gain), resident
                pl.BlockSpec((1, d), lambda i: (0, 0)),    # b_2 (bias), resident
            ],
            out_specs=pl.BlockSpec((tm, d), lambda i: (i, 0)),
        ),
        compiler_params=pltpu.CompilerParams(
            dimension_semantics=("parallel",),
            vmem_limit_bytes=_VMEM_LIMIT_BYTES,
        ),
    )(z, a_in, b_in)


def layer_norm_ref(z, a_2, b_2, eps=0.001):
    """Pure-JAX reference mirroring the PyTorch forward exactly (f32 math)."""
    if z.shape[1] == 1:
        return z
    zf = z.astype(jnp.float32)
    mu = jnp.mean(zf, axis=1, keepdims=True)
    sigma = jnp.std(zf, axis=1, ddof=1, keepdims=True)  # torch.std: unbiased
    out = (zf - mu) / (sigma + eps)
    return out * a_2.astype(jnp.float32)[None, :] + b_2.astype(jnp.float32)[None, :]


if __name__ == "__main__":
    key = jax.random.PRNGKey(0)
    k1, k2, k3 = jax.random.split(key, 3)

    # Case 1: small, non-lane-aligned hidden dim. D=32 < 128: the feature block
    # equals the full array dim (no wrapper pad / output slice anymore).
    n1, d1 = 16, 32
    z1 = jax.random.normal(k1, (n1, d1), dtype=jnp.float32)
    a1 = jnp.ones((d1,), dtype=jnp.float32)   # nn.Parameter(torch.ones(d_hid))
    b1 = jnp.zeros((d1,), dtype=jnp.float32)  # nn.Parameter(torch.zeros(d_hid))
    o1 = jax.block_until_ready(layer_norm(z1, a1, b1, eps=0.001))
    r1 = layer_norm_ref(z1, a1, b1, eps=0.001)
    assert o1.shape == z1.shape and o1.dtype == z1.dtype
    assert jnp.allclose(o1, r1, atol=2e-5, rtol=2e-5), "mismatch vs reference (case 1)"

    # Case 2: lane-dense D, N not a multiple of the row tile (masked partial
    # last row block on the smaller-tile generations) and non-trivial gain/bias.
    n2, d2 = 20, 128
    z2 = jax.random.normal(k2, (n2, d2), dtype=jnp.float32)
    a2 = jax.random.normal(jax.random.PRNGKey(1), (d2,), dtype=jnp.float32)
    b2 = jax.random.normal(jax.random.PRNGKey(2), (d2,), dtype=jnp.float32)
    o2 = jax.block_until_ready(layer_norm(z2, a2, b2, eps=0.001))
    r2 = layer_norm_ref(z2, a2, b2, eps=0.001)
    assert o2.shape == z2.shape and o2.dtype == z2.dtype
    assert jnp.allclose(o2, r2, atol=2e-5, rtol=2e-5), "mismatch vs reference (case 2)"

    # Case 3: bf16 input (exercises the low-precision tail on v6e/v7x; the f32
    # path runs on v5e). Statistics stay in f32, so a loose bf16 tolerance is
    # all that is needed.
    n3, d3 = 24, 256
    z3 = jax.random.normal(k3, (n3, d3), dtype=jnp.float32).astype(jnp.bfloat16)
    a3 = jnp.ones((d3,), dtype=jnp.float32)
    b3 = jnp.zeros((d3,), dtype=jnp.float32)
    o3 = jax.block_until_ready(layer_norm(z3, a3, b3, eps=0.001))
    r3 = layer_norm_ref(z3, a3, b3, eps=0.001)
    assert o3.shape == z3.shape and o3.dtype == z3.dtype
    assert jnp.allclose(o3.astype(jnp.float32), r3, atol=0.1, rtol=0.05), \
        "mismatch vs reference (case 3, bf16)"

    print("KERNEL_OK")
</pallas_src>

<mosaic_0001>
module attributes {stable_mosaic.version = 11 : i64} {
  func.func @_layer_norm_kernel(%arg0: i32, %arg1: memref<8x32xf32, #tpu.memory_space<vmem>>, %arg2: memref<1x32xf32, #tpu.memory_space<vmem>>, %arg3: memref<1x32xf32, #tpu.memory_space<vmem>>, %arg4: memref<8x32xf32, #tpu.memory_space<vmem>>) attributes {dimension_semantics = [#tpu.dimension_semantics<parallel>], iteration_bounds = array<i64: 2>, scalar_prefetch = 0 : i64, scratch_operands = 0 : i64, tpu.core_type = #tpu.core_type<tc>, window_params = [{transform_indices = @transform_0, window_bounds = array<i64: 8, 32>}, {pipeline_mode = #tpu.pipeline_mode<synchronous>, transform_indices = @transform_1, window_bounds = array<i64: 1, 32>}, {pipeline_mode = #tpu.pipeline_mode<synchronous>, transform_indices = @transform_2, window_bounds = array<i64: 1, 32>}, {transform_indices = @transform_3, window_bounds = array<i64: 8, 32>}]} {
    %c0 = arith.constant 0 : index
    %c0_0 = arith.constant 0 : index
    %0 = vector.load %arg1[%c0, %c0_0] : memref<8x32xf32, #tpu.memory_space<vmem>>, vector<8x32xf32>
    %cst = arith.constant dense<0.000000e+00> : vector<8xf32>
    %1 = vector.multi_reduction <add>, %0, %cst [1] : vector<8x32xf32> to vector<8xf32>
    %2 = vector.shape_cast %1 : vector<8xf32> to vector<8x1xf32>
    %cst_1 = arith.constant 3.125000e-02 : f32
    %3 = vector.broadcast %cst_1 : f32 to vector<8x1xf32>
    %4 = arith.mulf %2, %3 : vector<8x1xf32>
    %5 = vector.broadcast %4 : vector<8x1xf32> to vector<8x32xf32>
    %6 = arith.subf %0, %5 : vector<8x32xf32>
    %7 = arith.mulf %6, %6 : vector<8x32xf32>
    %cst_2 = arith.constant dense<0.000000e+00> : vector<8xf32>
    %8 = vector.multi_reduction <add>, %7, %cst_2 [1] : vector<8x32xf32> to vector<8xf32>
    %9 = vector.shape_cast %8 : vector<8xf32> to vector<8x1xf32>
    %cst_3 = arith.constant 0.0322580636 : f32
    %10 = vector.broadcast %cst_3 : f32 to vector<8x1xf32>
    %11 = arith.mulf %9, %10 : vector<8x1xf32>
    %12 = math.sqrt %11 : vector<8x1xf32>
    %cst_4 = arith.constant 1.000000e-03 : f32
    %13 = vector.broadcast %cst_4 : f32 to vector<8x1xf32>
    %14 = arith.addf %12, %13 : vector<8x1xf32>
    %15 = tpu.reciprocal %14 : vector<8x1xf32> -> vector<8x1xf32>
    %16 = vector.broadcast %15 : vector<8x1xf32> to vector<8x32xf32>
    %17 = arith.mulf %6, %16 : vector<8x32xf32>
    %c0_5 = arith.constant 0 : index
    %c0_6 = arith.constant 0 : index
    %18 = vector.load %arg2[%c0_5, %c0_6] : memref<1x32xf32, #tpu.memory_space<vmem>>, vector<1x32xf32>
    %19 = vector.broadcast %18 : vector<1x32xf32> to vector<8x32xf32>
    %20 = arith.mulf %17, %19 : vector<8x32xf32>
    %c0_7 = arith.constant 0 : index
    %c0_8 = arith.constant 0 : index
    %21 = vector.load %arg3[%c0_7, %c0_8] : memref<1x32xf32, #tpu.memory_space<vmem>>, vector<1x32xf32>
    %22 = vector.broadcast %21 : vector<1x32xf32> to vector<8x32xf32>
    %23 = arith.addf %20, %22 : vector<8x32xf32>
    %c0_9 = arith.constant 0 : index
    %c0_10 = arith.constant 0 : index
    %24 = vector.load %arg4[%c0_9, %c0_10] : memref<8x32xf32, #tpu.memory_space<vmem>>, vector<8x32xf32>
    tpu.vector_store %arg4[%c0_9, %c0_10], %23 {strides = array<i32>} : memref<8x32xf32, #tpu.memory_space<vmem>>, vector<8x32xf32>,
    return
  }
  func.func @transform_0(%arg0: i32) -> (i32, i32) {
    %c0_i32 = arith.constant 0 : i32
    %c0_i32_0 = arith.constant 0 : i32
    return %arg0, %c0_i32 : i32, i32
  }
  func.func @transform_1(%arg0: i32) -> (i32, i32) {
    %c0_i32 = arith.constant 0 : i32
    %c0_i32_0 = arith.constant 0 : i32
    %c0_i32_1 = arith.constant 0 : i32
    return %c0_i32, %c0_i32_0 : i32, i32
  }
  func.func @transform_2(%arg0: i32) -> (i32, i32) {
    %c0_i32 = arith.constant 0 : i32
    %c0_i32_0 = arith.constant 0 : i32
    %c0_i32_1 = arith.constant 0 : i32
    return %c0_i32, %c0_i32_0 : i32, i32
  }
  func.func @transform_3(%arg0: i32) -> (i32, i32) {
    %c0_i32 = arith.constant 0 : i32
    %c0_i32_0 = arith.constant 0 : i32
    return %arg0, %c0_i32 : i32, i32
  }
}

</mosaic_0001>

<bundles_post_ra>
// kernel: tpu_custom_call.1
= control target key start
LH: loop header
LB: loop body
LE: loop exit
PB: predicated region body
PF: predicated region fallthrough
CT: control target
= control target key end

     0   :  { %8 = vsyncpa [#allocation3], 0  ;;  %s667_s0 = inlined_call_operand.hbm [shape: f32[16,32], index: 0, kind: input, shape index: {}]   ;;  %s668_s1 = inlined_call_operand.vmem [shape: f32[1,32], index: 1, kind: input, shape index: {}]   ;;  %s669_s2 = inlined_call_operand.vmem [shape: f32[1,32], index: 2, kind: input, shape index: {}]   ;;  %s670_s3 = inlined_call_operand.hbm [shape: f32[16,32], index: 3, kind: output, shape index: {}]  }
   0x1   :  { %10 = vsyncpa [#allocation3 + $0x1], 0 }
   0x2   :  { %11 = vsyncpa [#allocation4], 0 }
   0x3   :  { %13 = vsyncpa [#allocation4 + $0x1], 0  ;;  %s493_s12 = smov 0   ;;  %s495_s13 = smov 0  }
   0x4   :  { %s497_s14 = smov 0   ;;  %s499_s15 = smov 0  }
   0x5 LB: > { %s514_s16 = sadd.s32 4294967295, %s469_s15   ;;  %s309_s17 = sadd.s32 4294967294, %s469_s15   ;;  %s469_s15 = sphi %s499_s15, %s685_s15   ;;  %s465_s14 = sphi %s497_s14, %s684_s14   ;;  %s461_s13 = sphi %s495_s13, %s683_s13   ;;  %s457_s12 = sphi %s493_s12, %s682_s12  }
   0x6   : > { %s518_s18 = sadd.s32 1, %s469_s15   ;;  %s26_s19 = sadd.s32 1, %s465_s14 }
   0x7   : > { %s23_s20 = ssub.s32 %s469_s15, %s518_s18  ;;  %p33_p0 = scmp.ne.s32.totalorder %s465_s14, %s461_s13 }
   0x8   : > { %p24_p1 = scmp.eq.s32.totalorder %s23_s20, 0  ;;  %p34_p2 = scmp.eq.s32.totalorder %s469_s15, 0 }
   0x9   : > { %p39_p3 = scmp.ne.s32.totalorder %s461_s13, %s457_s12  ;;  %p40_p4 = scmp.eq.s32.totalorder %s514_s16, 0 }
   0xa   : > { %s530_s21 = scalar_select %p24_p1, %s465_s14, %s26_s19  }
   0xb   : > { %p532_p5 = por %p34_p2, %p33_p0  ;;  %p536_p6 = por %p40_p4, %p39_p3 }
   0xc   : > { %p105_p7 = scmp.eq.s32.totalorder %s514_s16, 1  ;;  %p111_p8 = scmp.eq.s32.totalorder %s309_s17, 1 }
   0xd   : > { %p335_p10 = scmp.lt.s32.totalorder %s469_s15, 2  ;;  %s137_s26 = sand.u32 1, %s465_s14  }
   0xe   : > { %p543_p11 = por %p105_p7, %p33_p0  ;;  %p547_p12 = por %p111_p8, %p39_p3 }
   0xf   : > { %s313_s27 = sshll.u32 %s469_s15, 7  ;;  %s312_s28 = sshll.u32 %s137_s26, 3 }
  0x10   : > { %s674_s24 = scalar_select %p543_p11, 1, 0 }
  0x11   : > { %s675_s25 = scalar_select %p547_p12, 1, 0 }
  0x12   : > { %s556_s4 = scalar_lea.hbm %s667_s0, %s313_s27  ;;  %s141_s5 = scalar_lea.vmem [#allocation2], %s312_s28 }
  0x13   : > { %s148_s6 = sshll.u32 %s141_s5, 4  ;;  %p560_p13 = pnand %p335_p10, %p532_p5  ;;  %s564_s6 = int_to_ptr.vmem [resolvable:$true] %s148_s6 }
  0x14   : > { %s138_s8 = scalar_lea.sflag [#allocation3], %s137_s26  ;;  %s373_s9 = scalar_lea.hbm %s556_s4, 128 }
  0x15   : > { %p374_p2 = scmp.ne.s32.totalorder %s556_s4, %s373_s9  ;;  %p375_p3 = pneg %p560_p13 }
  0x16   : > { %s378_s17 = scalar_lea.hbm %s667_s0, 256  ;;  %p379_p5 = scmp.lt.u32.totalorder %s556_s4, %s667_s0 }
  0x17   : > { %p376_p4 = pnand %p375_p3, %p374_p2  ;;  %p380_p8 = scmp.lt.u32.totalorder %s378_s17, %s373_s9 }
  0x18   : > { %p382_p9 = scmp.lt.u32.totalorder %s373_s9, %s556_s4 }
  0x19   : > { %p377_p7 = pneg %p376_p4  ;;  %p381_p10 = por %p380_p8, %p379_p5 }
  0x1b   : > { %p383_p0 = por %p382_p9, %p381_p10 }
  0x1d   : > { %p384_p1 = pnand %p383_p0, %p377_p7 }
  0x1f   : > { %387 = shalt.err (!%p384_p1)
}
  0x20   : > { %s388_s22 = scalar_lea.vmem %s564_s6, 128  ;;  %s471_s26 = smov [#allocation2]  }
  0x21   : > { %p389_p2 = scmp.ne.s32.totalorder %s564_s6, %s388_s22  ;;  %s393_s27 = sshll.u32 %s471_s26, 4  ;;  %s394_s27 = int_to_ptr.vmem [resolvable:$false] %s393_s27 }
  0x22   : > { %s395_s28 = scalar_lea.vmem %s394_s27, 256  ;;  %p396_p11 = scmp.lt.s32.totalorder %s564_s6, %s394_s27 }
  0x23   : > { %p391_p4 = pnand %p389_p2, %p375_p3  ;;  %p397_p5 = scmp.lt.s32.totalorder %s395_s28, %s388_s22 }
  0x25   : > { %p392_p12 = pneg %p391_p4  ;;  %p398_p8 = por %p397_p5, %p396_p11 }
  0x27   : > { %p399_p9 = pnand %p398_p8, %p392_p12 }
  0x29   : > { %402 = shalt.err (!%p399_p9)
}
  0x2a   : > { %330 = dma.hbm_to_vmem [thread:$0]  (!%p560_p13), %s556_s4, 128, %s564_s6, %s138_s8  }
  0x2b   : > { %p677_p0 = scmp.lt.s32.totalorder %s469_s15, 3  ;;  %p678_p1 = scmp.ge.s32.totalorder %s469_s15, 1 }
  0x2d   : > { %p154_p3 = pnand %p678_p1, %p677_p0 }
  0x2e   : > { %s598_s29 = sand.u32 (!%p154_p3), 1, %s461_s13  }
  0x2f   : > { %157 = sbr.rel (%p154_p3) target bundleno = 398 (0x18e), region = 32  ;;  %s315_s30 = sshll.u32 (!%p154_p3), %s598_s29, 3 }
  0x30   : > { %s160_s5 = scalar_lea.sflag (!%p154_p3), [#allocation3], %s598_s29  ;;  %s163_s7 = scalar_lea.vmem (!%p154_p3), [#allocation2], %s315_s30 }
  0x36   : > { %448 = dma.done.wait (%p536_p6), %s160_s5, 128  }
  0x37   : > { %450 = vsyncadd (%p536_p6), %s160_s5, 4294967168  ;;  %vm187_vm0 = vcmask 261120   ;;  %v186_v0 = vld [vmem:[%s163_s7] sm:$0xff]  ;;  %s320_s9 = sshll.u32 %s514_s16, 7  ;;  %s185_s10 = scalar_lea.vmem [#allocation5], %s315_s30 }
  0x38   : > { %v188_v1 = vsel %vm187_vm0, %v186_v0, 0.0  ;;  %v317_v16 = vld [vmem:[%s668_s1] ss:$0 sm:$0xff]  ;;  %s239_s11 = sshll.u32 %s185_s10, 4  ;;  %s622_s20 = scalar_lea.hbm %s670_s3, %s320_s9  ;;  %s624_s11 = int_to_ptr.vmem [resolvable:$true] %s239_s11 }
  0x39   : > { %189 = vadd.xlane.f32.xlu0 %v188_v1  ;;  %v318_v18 = vld [vmem:[%s669_s2] ss:$0 sm:$0xff]  ;;  %s226_s22 = scalar_lea.sflag [#allocation4], %s598_s29  ;;  %s403_s26 = scalar_lea.vmem %s624_s11, 128 }
  0x3a   : > { %p404_p6 = scmp.ne.s32.totalorder %s624_s11, %s403_s26  ;;  %p679_p11 = scmp.ne.s32.totalorder %s674_s24, 0 }
  0x3b   : > { %s472_s16 = smov [#allocation5]  }
  0x3c   : > { %p405_p12 = pnand %p404_p6, %p679_p11  ;;  %s407_s27 = sshll.u32 %s472_s16, 4  ;;  %s408_s27 = int_to_ptr.vmem [resolvable:$false] %s407_s27 }
  0x3d   : > { %s409_s28 = scalar_lea.vmem %s408_s27, 256  ;;  %p410_p7 = scmp.lt.s32.totalorder %s624_s11, %s408_s27 }
  0x3e   : > { %p406_p13 = pneg %p405_p12  ;;  %p411_p10 = scmp.lt.s32.totalorder %s409_s28, %s403_s26 }
  0x40   : > { %p412_p2 = por %p411_p10, %p410_p7 }
  0x42   : > { %p413_p4 = pnand %p412_p2, %p406_p13 }
  0xc6   : > { %v190_v2 = vpop.xlane.xlu0 %189 }
  0xc7   : > { %v191_v3 = vmul.f32 0.03125, %v190_v2 }
  0xc9   : > { %v192_v4 = vsub.f32 %v186_v0, %v191_v3 }
  0xcb   : > { %v193_v5 = vmul.f32 %v192_v4, %v192_v4 }
  0xcd   : > { %v194_v6 = vsel %vm187_vm0, %v193_v5, 0.0 }
  0xce   : > { %195 = vadd.xlane.f32.xlu0 %v194_v6 }
 0x15b   : > { %v196_v7 = vpop.xlane.xlu0 %195 }
 0x15c   : > { %v197_v8 = vmul.f32 0.032258064, %v196_v7 }
 0x15e   : > { %369 = vrsqrt.f32 %v197_v8  ;;  %vm200_vm1 = vcmp.eq.f32.partialorder %v197_v8, inf  ;;  %v203_v11 = vand.u32 2147483648, %v197_v8  ;;  %vm202_vm2 = vcmp.eq.f32.partialorder %v197_v8, 0.0 }
 0x168   : > { %v370_v9 = vpop.eup %369 }
 0x169   : > { %v199_v10 = vmul.f32 %v370_v9, %v197_v8 }
 0x16b   : > { %v201_v12 = vsel %vm200_vm1, %v197_v8, %v199_v10 }
 0x16c   : > { %v204_v13 = vsel %vm202_vm2, %v203_v11, %v201_v12 }
 0x16d   : > { %v205_v14 = vadd.f32 0.001, %v204_v13 }
 0x16f   : > { %371 = vrcp.f32 %v205_v14 }
 0x179   : > { %v372_v15 = vpop.eup %371 }
 0x17a   : > { %v207_v17 = vmul.f32 %v372_v15, %v192_v4 }
 0x17c   : > { %v215_v19 = vmul.f32 %v317_v16, %v207_v17 }
 0x17e   : > { %v223_v20 = vadd.f32 %v318_v18, %v215_v19 }
 0x180   : > { %224 = vst.msk [vmem:[%s185_s10] sm:$0xff] %vm187_vm0, %v223_v20 }
 0x181   : > { %416 = shalt.err (!%p413_p4)
}
 0x182   : > { %s417_s29 = scalar_lea.hbm %s622_s20, 128  ;;  %s421_s7 = scalar_lea.hbm %s670_s3, 256 }
 0x183   : > { %p418_p5 = scmp.ne.s32.totalorder %s622_s20, %s417_s29  ;;  %p422_p0 = scmp.lt.u32.totalorder %s622_s20, %s670_s3 }
 0x184   : > { %p423_p1 = scmp.lt.u32.totalorder %s421_s7, %s417_s29  ;;  %p425_p6 = scmp.lt.u32.totalorder %s417_s29, %s622_s20 }
 0x185   : > { %p419_p8 = pnand %p418_p5, %p679_p11 }
 0x186   : > { %p424_p3 = por %p423_p1, %p422_p0 }
 0x187   : > { %p420_p9 = pneg %p419_p8 }
 0x188   : > { %p426_p12 = por %p425_p6, %p424_p3 }
 0x18a   : > { %p427_p13 = pnand %p426_p12, %p420_p9 }
 0x18c   : > { %430 = shalt.err (!%p427_p13)
}
 0x18d   : > { %325 = dma.vmem_to_hbm [thread:$0]  (%p679_p11), %s624_s11, 128, %s622_s20, %s226_s22  }
 0x18e PF: > { %s251_s6 = sand.u32 1, %s457_s12   ;;  %p680_p7 = scmp.ne.s32.totalorder %s675_s25, 0 }
 0x18f   : > { %p681_p10 = scmp.ge.s32.totalorder %s469_s15, 2  ;;  %s252_s8 = scalar_lea.sflag [#allocation4], %s251_s6 }
 0x191   : > { %p332_p2 = pnand %p681_p10, %p680_p7 }
 0x193   : > { %452 = dma.done.wait (!%p332_p2), %s252_s8, 128  }
 0x194   : > { %454 = vsyncadd (!%p332_p2), %s252_s8, 4294967168  ;;  %p16_p4 = scmp.ge.s32.totalorder %s518_s18, 4   ;;  %s682_s12 = smov %s461_s13 }
 0x195   : > { %s683_s13 = smov %s465_s14  ;;  %s684_s14 = smov %s530_s21 }
 0x196   : > { %s685_s15 = smov %s518_s18  ;;  %18 = sbr.rel (!%p16_p4) target bundleno = 5 (0x5), region = 77 }
 0x19d   :  { %257 = vsyncpa [#allocation3], 1 }
 0x19e   :  { %259 = vsyncpa [#allocation3 + $0x1], 1 }
 0x19f   :  { %260 = vsyncpa [#allocation4], 1 }
 0x1a0   :  { %262 = vsyncpa [#allocation4 + $0x1], 1 }

</bundles_post_ra>
